<compile_context>
chip_gen: v5e
topology: v5e:2x2
jax: 0.10.0
libtpu: 0.0.40
codegen_flags: <defaults>
</compile_context>

<pallas_src>
import jax
import jax.numpy as jnp
from jax.experimental import pallas as pl
from jax.experimental.pallas import tpu as pltpu


def _round_up(n: int, m: int) -> int:
    return ((n + m - 1) // m) * m


def _pad_rows(a, target_rows: int):
    if a.shape[0] == target_rows:
        return a
    pad = ((0, target_rows - a.shape[0]),) + ((0, 0),) * (a.ndim - 1)
    return jnp.pad(a, pad)


# ---------------------------------------------------------------------------
# Kernel 1: joint / permuted path
#   T = relu(x @ w1x + y @ w1y + b1) . w2 + b2        (per row tile)
# ---------------------------------------------------------------------------
def _mine_joint_kernel(x_ref, y_ref, w1x_ref, w1y_ref, b1_ref, w2t_ref, b2_ref, t_ref):
    # x: [tb, Dx] bf16, y: [tb, Dy] bf16, w1x: [Dx, H] bf16, w1y: [Dy, H] bf16
    # b1: [1, H] f32, w2t: [1, H] f32, b2: SMEM (1,) f32, t: [tb, 1] f32
    hx = jnp.dot(x_ref[...], w1x_ref[...], preferred_element_type=jnp.float32)
    hy = jnp.dot(y_ref[...], w1y_ref[...], preferred_element_type=jnp.float32)
    h = jnp.maximum(hx + hy + b1_ref[...], 0.0)            # f32 bias + ReLU on VPU
    # N=1 "matmul" as VPU multiply + XLU lane reduction (MXU would waste 127/128 cols)
    t = jnp.sum(h * w2t_ref[...], axis=-1, keepdims=True)
    t_ref[...] = t + b2_ref[0]


def _mine_t_pallas(x, y, w1x, w1y, b1, w2t, b2, *, max_tile_rows=512):
    B, Dx = x.shape
    Dy = y.shape[1]
    H = w1x.shape[1]
    tile_b = min(_round_up(B, 8), max_tile_rows)
    Bp = _round_up(B, tile_b)
    xp, yp = _pad_rows(x, Bp), _pad_rows(y, Bp)
    out = pl.pallas_call(
        _mine_joint_kernel,
        out_shape=jax.ShapeDtypeStruct((Bp, 1), jnp.float32),
        grid_spec=pltpu.PrefetchScalarGridSpec(
            num_scalar_prefetch=0,
            grid=(Bp // tile_b,),
            in_specs=[
                pl.BlockSpec((tile_b, Dx), lambda i: (i, 0)),   # x row tile (streamed)
                pl.BlockSpec((tile_b, Dy), lambda i: (i, 0)),   # y row tile (streamed)
                pl.BlockSpec((Dx, H), lambda i: (0, 0)),        # weights stay VMEM-resident
                pl.BlockSpec((Dy, H), lambda i: (0, 0)),
                pl.BlockSpec((1, H), lambda i: (0, 0)),
                pl.BlockSpec((1, H), lambda i: (0, 0)),
                pl.BlockSpec(memory_space=pltpu.MemorySpace.SMEM),  # b2 scalar
            ],
            out_specs=pl.BlockSpec((tile_b, 1), lambda i: (i, 0)),
        ),
        compiler_params=pltpu.CompilerParams(dimension_semantics=("parallel",)),
    )(xp, yp, w1x, w1y, b1, w2t, b2)
    return out[:B]


# ---------------------------------------------------------------------------
# Kernel 2: per-sample hidden pre-activation projection  h = a @ w   ([B, H])
# (used by the 'product' fast path; avoids re-doing the D->H matmul B times)
# ---------------------------------------------------------------------------
def _proj_kernel(a_ref, w_ref, h_ref):
    h_ref[...] = jnp.dot(a_ref[...], w_ref[...], preferred_element_type=jnp.float32)


def _proj_pallas(a, w, *, max_tile_rows=1024):
    B, D = a.shape
    H = w.shape[1]
    tile_b = min(_round_up(B, 8), max_tile_rows)
    Bp = _round_up(B, tile_b)
    ap = _pad_rows(a, Bp)
    out = pl.pallas_call(
        _proj_kernel,
        out_shape=jax.ShapeDtypeStruct((Bp, H), jnp.float32),
        grid_spec=pltpu.PrefetchScalarGridSpec(
            num_scalar_prefetch=0,
            grid=(Bp // tile_b,),
            in_specs=[
                pl.BlockSpec((tile_b, D), lambda i: (i, 0)),
                pl.BlockSpec((D, H), lambda i: (0, 0)),
            ],
            out_specs=pl.BlockSpec((tile_b, H), lambda i: (i, 0)),
        ),
        compiler_params=pltpu.CompilerParams(dimension_semantics=("parallel",)),
    )(ap, w)
    return out[:B]


# ---------------------------------------------------------------------------
# Kernel 3: product-marginal pair grid
#   T[j, i] = relu(hx[i] + hy[j] + b1) . w2 + b2       (lane-dense [tj, ti] output)
# ---------------------------------------------------------------------------
def _mine_pair_kernel(hy_ref, hx_ref, b1_ref, w2t_ref, b2_ref, t_ref):
    # hy: [tj, H] f32, hx: [ti, H] f32, b1/w2t: [1, H] f32, t: [tj, ti] f32
    h = hx_ref[...][None, :, :] + hy_ref[...][:, None, :] + b1_ref[...][None, :, :]
    h = jnp.maximum(h, 0.0)
    t = jnp.sum(h * w2t_ref[...][None, :, :], axis=-1)      # lane reduce over H
    t_ref[...] = t + b2_ref[0]


def _mine_t_product_pallas(hx, hy, b1, w2t, b2):
    Bx, H = hx.shape
    By = hy.shape[0]
    # ti sits on the lane axis of the output -> 128-wide tiles (or full dim if small).
    if Bx <= 128:
        ti, Bxp = Bx, Bx
    else:
        ti, Bxp = 128, _round_up(Bx, 128)
    # tj is the sublane axis; small tile keeps the [tj, ti, H] intermediate in check.
    if By <= 8:
        tj, Byp = By, By
    else:
        tj, Byp = 8, _round_up(By, 8)
    hxp, hyp = _pad_rows(hx, Bxp), _pad_rows(hy, Byp)
    slab = pl.pallas_call(
        _mine_pair_kernel,
        out_shape=jax.ShapeDtypeStruct((Byp, Bxp), jnp.float32),
        grid_spec=pltpu.PrefetchScalarGridSpec(
            num_scalar_prefetch=0,
            grid=(Byp // tj, Bxp // ti),
            in_specs=[
                pl.BlockSpec((tj, H), lambda j, i: (j, 0)),
                pl.BlockSpec((ti, H), lambda j, i: (i, 0)),
                pl.BlockSpec((1, H), lambda j, i: (0, 0)),
                pl.BlockSpec((1, H), lambda j, i: (0, 0)),
                pl.BlockSpec(memory_space=pltpu.MemorySpace.SMEM),
            ],
            out_specs=pl.BlockSpec((tj, ti), lambda j, i: (j, i)),
        ),
        compiler_params=pltpu.CompilerParams(
            dimension_semantics=("parallel", "parallel")),
    )(hyp, hxp, b1, w2t, b2)
    slab = slab[:By, :Bx]
    # torch ordering: row k = j*Bx + i  <->  pair (x_i, y_j)
    return slab.reshape(By * Bx, 1)


# ---------------------------------------------------------------------------
# MINE module (JAX), mirroring the torch semantics
# ---------------------------------------------------------------------------
class MINE:
    # TODO(synk): base-class forward is abstract in torch; this is the canonical
    # MINE MLP T-network used as the concrete statistics network.
    def __init__(self, dim_x: int, dim_y: int, hidden: int = 128, seed: int = 0):
        k1, k2, k3, k4 = jax.random.split(jax.random.PRNGKey(seed), 4)
        d_in = dim_x + dim_y
        w1 = jax.random.normal(k1, (d_in, hidden), jnp.float32) / jnp.sqrt(d_in)
        self.w1x = w1[:dim_x]            # [Dx, H]
        self.w1y = w1[dim_x:]            # [Dy, H]
        self.b1 = jax.random.normal(k2, (1, hidden), jnp.float32) * 0.01
        # w2 stored transposed [1, H] so the second matmul becomes a lane reduction.
        self.w2t = jax.random.normal(k3, (1, hidden), jnp.float32) / jnp.sqrt(hidden)
        self.b2 = jax.random.normal(k4, (1,), jnp.float32) * 0.01     # SMEM scalar
        # bf16 copies of streamed weights (MXU-native, halves DMA bytes)
        self.w1x_bf16 = self.w1x.astype(jnp.bfloat16)
        self.w1y_bf16 = self.w1y.astype(jnp.bfloat16)
        self._perm_key = jax.random.PRNGKey(seed + 1234)

    # --- reproduces MINE._marginalize (torch.randperm -> fresh key per call) ---
    def _marginalize(self, x, y, marginalize=False, key=None):
        if isinstance(marginalize, bool):
            if marginalize:
                marginalize = "permute"
            else:
                return x, y
        elif not isinstance(marginalize, str):
            raise ValueError("`marginalize` must be either `bool` or `str`")
        elif marginalize not in ["permute", "product"]:
            raise ValueError("`marginalize` must be either 'permute' or 'product'")
        if marginalize == "permute":
            if key is None:
                self._perm_key, key = jax.random.split(self._perm_key)
            x = x[jax.random.permutation(key, x.shape[0])]
        elif marginalize == "product":
            n = x.shape[0]
            y = jnp.repeat(y, n, axis=0)
            x = jnp.tile(x, (y.shape[0] // n,) + (1,) * (x.ndim - 1))
        return x, y

    # --- reproduces @marginalizable forward ---
    def forward(self, x, y, marginalize=False, key=None):
        x = jnp.asarray(x, jnp.float32)
        y = jnp.asarray(y, jnp.float32)
        if isinstance(marginalize, str) and marginalize == "product":
            # Fast path: algebraically identical to running T on the
            # repeat_interleave/repeat'ed pair grid, but never materializes the
            # B^2-row concat in HBM and reuses the D->H projections.
            hx = _proj_pallas(x.astype(jnp.bfloat16), self.w1x_bf16)
            hy = _proj_pallas(y.astype(jnp.bfloat16), self.w1y_bf16)
            return _mine_t_product_pallas(hx, hy, self.b1, self.w2t, self.b2)
        x, y = self._marginalize(x, y, marginalize, key)
        return _mine_t_pallas(x.astype(jnp.bfloat16), y.astype(jnp.bfloat16),
                              self.w1x_bf16, self.w1y_bf16,
                              self.b1, self.w2t, self.b2)

    __call__ = forward


# ---------------------------------------------------------------------------
# Pure-JAX reference (f32, highest precision) for the self-test
# ---------------------------------------------------------------------------
def _t_ref(x, y, w1x, w1y, b1, w2t, b2):
    hp = jax.lax.Precision.HIGHEST
    h = jnp.maximum(jnp.dot(x, w1x, precision=hp)
                    + jnp.dot(y, w1y, precision=hp) + b1, 0.0)
    return jnp.sum(h * w2t, axis=-1, keepdims=True) + b2[0]


if __name__ == "__main__":
    B, Dx, Dy, H = 8, 16, 16, 128
    key = jax.random.PRNGKey(0)
    kx, ky = jax.random.split(key)
    x = jax.random.normal(kx, (B, Dx), jnp.float32)
    y = jax.random.normal(ky, (B, Dy), jnp.float32)

    model = MINE(Dx, Dy, hidden=H, seed=0)

    t_joint = model(x, y)
    t_perm = model(x, y, marginalize="permute", key=jax.random.PRNGKey(7))
    t_prod = model(x, y, marginalize="product")
    t_joint, t_perm, t_prod = jax.block_until_ready((t_joint, t_perm, t_prod))

    assert t_joint.shape == (B, 1)
    assert t_perm.shape == (B, 1)
    assert t_prod.shape == (B * B, 1)

    # Strict check: f32 reference fed the same bf16-quantized inputs/weights.
    xb = x.astype(jnp.bfloat16).astype(jnp.float32)
    yb = y.astype(jnp.bfloat16).astype(jnp.float32)
    w1xb = model.w1x_bf16.astype(jnp.float32)
    w1yb = model.w1y_bf16.astype(jnp.float32)
    ref_strict = _t_ref(xb, yb, w1xb, w1yb, model.b1, model.w2t, model.b2)
    assert jnp.allclose(t_joint, ref_strict, atol=1e-3, rtol=1e-3)

    # Loose check vs the full-f32 reference (bf16 streaming tolerance).
    ref_f32 = _t_ref(x, y, model.w1x, model.w1y, model.b1, model.w2t, model.b2)
    assert jnp.allclose(t_joint, ref_f32, atol=1e-1, rtol=1e-1)

    # Product path: torch ordering row k = j*B + i -> pair (x_i, y_j).
    yr = jnp.repeat(yb, B, axis=0)
    xr = jnp.tile(xb, (B, 1))
    ref_prod = _t_ref(xr, yr, w1xb, w1yb, model.b1, model.w2t, model.b2)
    assert jnp.allclose(t_prod, ref_prod, atol=1e-3, rtol=1e-3)

    # Diagonal of the pair grid (pairs (x_i, y_i)) must match the joint T.
    diag = t_prod.reshape(B, B)[jnp.arange(B), jnp.arange(B)].reshape(B, 1)
    assert jnp.allclose(diag, t_joint, atol=1e-3, rtol=1e-3)

    print("KERNEL_OK")
</pallas_src>

<mosaic_0001>
module attributes {stable_mosaic.version = 11 : i64} {
  func.func @_mine_joint_kernel(%arg0: i32, %arg1: memref<8x16xbf16, #tpu.memory_space<vmem>>, %arg2: memref<8x16xbf16, #tpu.memory_space<vmem>>, %arg3: memref<16x128xbf16, #tpu.memory_space<vmem>>, %arg4: memref<16x128xbf16, #tpu.memory_space<vmem>>, %arg5: memref<1x128xf32, #tpu.memory_space<vmem>>, %arg6: memref<1x128xf32, #tpu.memory_space<vmem>>, %arg7: memref<1xf32, #tpu.memory_space<smem>>, %arg8: memref<8x1xf32, #tpu.memory_space<vmem>>) attributes {dimension_semantics = [#tpu.dimension_semantics<parallel>], iteration_bounds = array<i64: 1>, scalar_prefetch = 0 : i64, scratch_operands = 0 : i64, tpu.core_type = #tpu.core_type<tc>, window_params = [{transform_indices = @transform_0, window_bounds = array<i64: 8, 16>}, {transform_indices = @transform_1, window_bounds = array<i64: 8, 16>}, {pipeline_mode = #tpu.pipeline_mode<synchronous>, transform_indices = @transform_2, window_bounds = array<i64: 16, 128>}, {pipeline_mode = #tpu.pipeline_mode<synchronous>, transform_indices = @transform_3, window_bounds = array<i64: 16, 128>}, {pipeline_mode = #tpu.pipeline_mode<synchronous>, transform_indices = @transform_4, window_bounds = array<i64: 1, 128>}, {pipeline_mode = #tpu.pipeline_mode<synchronous>, transform_indices = @transform_5, window_bounds = array<i64: 1, 128>}, {transform_indices = @transform_6, window_bounds = array<i64: 1>}, {transform_indices = @transform_7, window_bounds = array<i64: 8, 1>}]} {
    %c0 = arith.constant 0 : index
    %c0_0 = arith.constant 0 : index
    %0 = vector.load %arg1[%c0, %c0_0] : memref<8x16xbf16, #tpu.memory_space<vmem>>, vector<8x16xbf16>
    %c0_1 = arith.constant 0 : index
    %c0_2 = arith.constant 0 : index
    %1 = vector.load %arg3[%c0_1, %c0_2] : memref<16x128xbf16, #tpu.memory_space<vmem>>, vector<16x128xbf16>
    %cst = arith.constant dense<0.000000e+00> : vector<8x128xf32>
    %2 = tpu.matmul %0, %1, %cst {dimension_numbers = #tpu.dot_dimension_numbers<[1], [0], [0], [1], [0, 0, 1, 1], [], []>} : vector<8x16xbf16>, vector<16x128xbf16>, vector<8x128xf32> -> vector<8x128xf32>
    %c0_3 = arith.constant 0 : index
    %c0_4 = arith.constant 0 : index
    %3 = vector.load %arg2[%c0_3, %c0_4] : memref<8x16xbf16, #tpu.memory_space<vmem>>, vector<8x16xbf16>
    %c0_5 = arith.constant 0 : index
    %c0_6 = arith.constant 0 : index
    %4 = vector.load %arg4[%c0_5, %c0_6] : memref<16x128xbf16, #tpu.memory_space<vmem>>, vector<16x128xbf16>
    %cst_7 = arith.constant dense<0.000000e+00> : vector<8x128xf32>
    %5 = tpu.matmul %3, %4, %cst_7 {dimension_numbers = #tpu.dot_dimension_numbers<[1], [0], [0], [1], [0, 0, 1, 1], [], []>} : vector<8x16xbf16>, vector<16x128xbf16>, vector<8x128xf32> -> vector<8x128xf32>
    %6 = arith.addf %2, %5 : vector<8x128xf32>
    %c0_8 = arith.constant 0 : index
    %c0_9 = arith.constant 0 : index
    %7 = vector.load %arg5[%c0_8, %c0_9] : memref<1x128xf32, #tpu.memory_space<vmem>>, vector<1x128xf32>
    %8 = vector.broadcast %7 : vector<1x128xf32> to vector<8x128xf32>
    %9 = arith.addf %6, %8 : vector<8x128xf32>
    %cst_10 = arith.constant 0.000000e+00 : f32
    %10 = vector.broadcast %cst_10 : f32 to vector<8x128xf32>
    %11 = arith.maximumf %9, %10 : vector<8x128xf32>
    %c0_11 = arith.constant 0 : index
    %c0_12 = arith.constant 0 : index
    %12 = vector.load %arg6[%c0_11, %c0_12] : memref<1x128xf32, #tpu.memory_space<vmem>>, vector<1x128xf32>
    %13 = vector.broadcast %12 : vector<1x128xf32> to vector<8x128xf32>
    %14 = arith.mulf %11, %13 : vector<8x128xf32>
    %cst_13 = arith.constant dense<0.000000e+00> : vector<8xf32>
    %15 = vector.multi_reduction <add>, %14, %cst_13 [1] : vector<8x128xf32> to vector<8xf32>
    %16 = vector.shape_cast %15 : vector<8xf32> to vector<8x1xf32>
    %c0_14 = arith.constant 0 : index
    %17 = memref.load %arg7[%c0_14] : memref<1xf32, #tpu.memory_space<smem>>
    %18 = vector.broadcast %17 : f32 to vector<8x1xf32>
    %19 = arith.addf %16, %18 : vector<8x1xf32>
    %c0_15 = arith.constant 0 : index
    %c0_16 = arith.constant 0 : index
    %20 = vector.load %arg8[%c0_15, %c0_16] : memref<8x1xf32, #tpu.memory_space<vmem>>, vector<8x1xf32>
    tpu.vector_store %arg8[%c0_15, %c0_16], %19 {strides = array<i32>} : memref<8x1xf32, #tpu.memory_space<vmem>>, vector<8x1xf32>,
    return
  }
  func.func @transform_0(%arg0: i32) -> (i32, i32) {
    %c0_i32 = arith.constant 0 : i32
    %c0_i32_0 = arith.constant 0 : i32
    return %arg0, %c0_i32 : i32, i32
  }
  func.func @transform_1(%arg0: i32) -> (i32, i32) {
    %c0_i32 = arith.constant 0 : i32
    %c0_i32_0 = arith.constant 0 : i32
    return %arg0, %c0_i32 : i32, i32
  }
  func.func @transform_2(%arg0: i32) -> (i32, i32) {
    %c0_i32 = arith.constant 0 : i32
    %c0_i32_0 = arith.constant 0 : i32
    %c0_i32_1 = arith.constant 0 : i32
    return %c0_i32, %c0_i32_0 : i32, i32
  }
  func.func @transform_3(%arg0: i32) -> (i32, i32) {
    %c0_i32 = arith.constant 0 : i32
    %c0_i32_0 = arith.constant 0 : i32
    %c0_i32_1 = arith.constant 0 : i32
    return %c0_i32, %c0_i32_0 : i32, i32
  }
  func.func @transform_4(%arg0: i32) -> (i32, i32) {
    %c0_i32 = arith.constant 0 : i32
    %c0_i32_0 = arith.constant 0 : i32
    %c0_i32_1 = arith.constant 0 : i32
    return %c0_i32, %c0_i32_0 : i32, i32
  }
  func.func @transform_5(%arg0: i32) -> (i32, i32) {
    %c0_i32 = arith.constant 0 : i32
    %c0_i32_0 = arith.constant 0 : i32
    %c0_i32_1 = arith.constant 0 : i32
    return %c0_i32, %c0_i32_0 : i32, i32
  }
  func.func @transform_6(%arg0: i32) -> i32 {
    %c0_i32 = arith.constant 0 : i32
    %c0_i32_0 = arith.constant 0 : i32
    return %c0_i32 : i32
  }
  func.func @transform_7(%arg0: i32) -> (i32, i32) {
    %c0_i32 = arith.constant 0 : i32
    %c0_i32_0 = arith.constant 0 : i32
    return %arg0, %c0_i32 : i32, i32
  }
}

</mosaic_0001>

<bundles_post_ra>
// kernel: tpu_custom_call.1
= control target key start
LH: loop header
LB: loop body
LE: loop exit
PB: predicated region body
PF: predicated region fallthrough
CT: control target
= control target key end

     0   :  { %13 = vsyncpa [#allocation4], 0  ;;  %s355_s0 = inlined_call_operand.hbm [shape: bf16[8,16], index: 0, kind: input, shape index: {}]   ;;  %s356_s1 = inlined_call_operand.hbm [shape: bf16[8,16], index: 1, kind: input, shape index: {}]   ;;  %s357_s2 = inlined_call_operand.hbm [shape: bf16[16,128], index: 2, kind: input, shape index: {}]   ;;  %s358_s3 = inlined_call_operand.hbm [shape: bf16[16,128], index: 3, kind: input, shape index: {}]   ;;  %s359_s4 = inlined_call_operand.vmem [shape: f32[1,128], index: 4, kind: input, shape index: {}]   ;;  %s360_s5 = inlined_call_operand.vmem [shape: f32[1,128], index: 5, kind: input, shape index: {}]   ;;  %s361_s6 = inlined_call_operand.<no memory space> [shape: f32[1], index: 6, kind: input, shape index: {}]   ;;  %s362_s7 = inlined_call_operand.vmem [shape: f32[8,1], index: 7, kind: output, shape index: {}]  }
   0x1   :  { %14 = vsyncpa [#allocation6], 0  ;;  %s32_s26 = sshll.u32 %s356_s1, 4  ;;  %s33_s26 = int_to_ptr.hbm [resolvable:$true] %s32_s26 }
   0x2   :  { %15 = vsyncpa [#allocation9], 0  ;;  %s285_s27 = smov [#allocation5]   ;;  %s21_s8 = sshll.u32 %s355_s0, 4  ;;  %s22_s8 = int_to_ptr.hbm [resolvable:$true] %s21_s8 }
   0x3   :  { %s34_s28 = sshll.u32 %s285_s27, 4  ;;  %s286_s9 = smov [#allocation3]   ;;  %s35_s28 = int_to_ptr.vmem [resolvable:$true] %s34_s28 }
   0x4   :  { %37 = dma.hbm_to_vmem [thread:$0]  %s33_s26, 64, %s35_s28, [#allocation6]  }
   0x5   :  { %s23_s10 = sshll.u32 %s286_s9, 4  ;;  %s42_s13 = sshll.u32 %s357_s2, 4  ;;  %s24_s10 = int_to_ptr.vmem [resolvable:$true] %s23_s10  ;;  %s43_s13 = int_to_ptr.hbm [resolvable:$true] %s42_s13 }
   0x6   :  { %26 = dma.hbm_to_vmem [thread:$0]  %s22_s8, 64, %s24_s10, [#allocation4]  }
   0x7   :  { %s287_s1 = smov [#allocation7]   ;;  %s55_s17 = sshll.u32 %s358_s3, 4  ;;  %s56_s17 = int_to_ptr.hbm [resolvable:$true] %s55_s17 }
   0x8   :  { %s44_s14 = sshll.u32 %s287_s1, 4  ;;  %s288_s18 = smov 64   ;;  %s45_s14 = int_to_ptr.vmem [resolvable:$true] %s44_s14 }
   0x9   :  { %s289_s0 = smov 4   ;;  %s290_s19 = smov [#allocation8]  }
   0xa   :  { %50 = dma.hbm_to_vmem [thread:$0]  %s43_s13, 128, %s45_s14, [#allocation6], %s288_s18, %s288_s18, %s289_s0  }
   0xb   :  { %s57_s20 = sshll.u32 %s290_s19, 4  ;;  %s58_s20 = int_to_ptr.vmem [resolvable:$true] %s57_s20 }
   0xc   :  { %63 = dma.hbm_to_vmem [thread:$0]  %s56_s17, 128, %s58_s20, [#allocation9], %s288_s18, %s288_s18, %s289_s0  }
   0xd   :  { %279 = dma.done.wait [#allocation4], 64  }
   0xe   :  { %280 = vsyncadd [#allocation4], 4294967232 }
   0xf   :  { %281 = dma.done.wait [#allocation6], 192  }
  0x10   :  { %282 = vsyncadd [#allocation6], 4294967104 }
  0x11   :  { %283 = dma.done.wait [#allocation9], 128  }
  0x12   :  { %284 = vsyncadd [#allocation9], 4294967168  ;;  %v174_v0 = vld [vmem:[#allocation8] sm:$0xff]  ;;  %v173_v1 = vld [vmem:[#allocation7] sm:$0xff]  ;;  %vm99_vm0 = vcmask 130048   ;;  %v152_v14 = vstv %s361_s6  ;;  %vm154_vm1 = vcmask 7168  }
  0x13   :  { %110 = vmatpush.bf16.msra.mxu0 %v174_v0  ;;  %132 = vmatpush.bf16.msra.mxu1 %v173_v1  ;;  %v90_v2 = vld [vmem:[#allocation5] sm:$0xf]  ;;  %v87_v3 = vld [vmem:[#allocation3] sm:$0xf] }
  0x14   :  { %v181_v4 = vld [vmem:[%s359_s4] ss:$0 sm:$0xff] }
  0x15   :  { %v182_v9 = vld [vmem:[%s360_s5] ss:$0 sm:$0xff] }
  0x16   :  { %167 = vmatmul.msk.bf16.vlgmr.msra.gmra.mxu0 %vm99_vm0, %v90_v2  ;;  %172 = vmatmul.msk.bf16.vlgmr.msra.gmra.mxu1 %vm99_vm0, %v87_v3 }
  0x93   :  { %v112_v5 = vpop.f32.mrf.mxu0  ;;  %v134_v6 = vpop.f32.mrf.mxu1 }
  0x94   :  { %v135_v7 = vadd.f32 %v134_v6, %v112_v5 }
  0x96   :  { %v142_v8 = vadd.f32 %v181_v4, %v135_v7 }
  0x98   :  { %v143_v10 = vmax.f32 %v142_v8, 0.0 }
  0x9a   :  { %v148_v11 = vmul.f32 %v182_v9, %v143_v10 }
  0x9b   :  { %v114_v12 = vpop.f32.mrf.mxu0  ;;  %v136_v13 = vpop.f32.mrf.mxu1 }
  0x9c   :  { %149 = vadd.xlane.f32.xlu0 %v148_v11 }
 0x10f   :  { %v150_v15 = vpop.xlane.xlu0 %149 }
 0x110   :  { %v153_v16 = vadd.f32 %v152_v14, %v150_v15 }
 0x112   :  { %155 = vst.msk [vmem:[%s362_s7] sm:$0xff] %vm154_vm1, %v153_v16 }
 0x113   :  { %160 = vsyncpa [#allocation4], 1 }
 0x114   :  { %161 = vsyncpa [#allocation6], 1 }
 0x115   :  { %162 = vsyncpa [#allocation9], 1 }

</bundles_post_ra>
